<compile_context>
chip_gen: v7x
topology: tpu7x:2x2x1
jax: 0.10.0
libtpu: 0.0.40
codegen_flags: <defaults>
</compile_context>

<pallas_src>
import jax
import jax.numpy as jnp
import numpy as np
from jax.experimental import pallas as pl
from jax.experimental.pallas import tpu as pltpu

_LANES = 128
_MAX_TILE_ROWS = 8192              # 8192 x 128 f32 = 4 MiB per input block
_NUM_CORES = 2                     # leading "parallel" axis (v7x dual TC)
_VMEM_LIMIT = 32 * 1024 * 1024     # safe on v5e/v6e/v7x; >> 16 MiB of buffers


def _mse_partial_kernel(p_ref, t_ref, o_ref):
    """Accumulate per-lane sums of (p - t)^2 into a resident (1,128) output."""
    i = pl.program_id(1)                       # reduction ("arbitrary") axis

    @pl.when(i == 0)
    def _():
        o_ref[...] = jnp.zeros_like(o_ref)

    d = p_ref[...].astype(jnp.float32) - t_ref[...].astype(jnp.float32)
    # Per-lane partial sums only; the cross-lane reduce and the 1/n scale are
    # done in jnp outside the kernel (no masked (1,1) store epilogue).
    o_ref[...] += jnp.sum(d * d, axis=0, keepdims=True)


def _min_sublanes(dtype):
    # Native TPU tiling: (8,128) f32, (16,128) bf16/f16, (32,128) int8/fp8.
    return {4: 8, 2: 16, 1: 32}.get(jnp.dtype(dtype).itemsize, 8)


@jax.jit
def _mse_pallas(predicted, target):
    if predicted.shape != target.shape:
        # TODO(synk): torch MSELoss broadcasts mismatched shapes (with a
        # warning); this implementation requires identical shapes.
        raise ValueError(f"shape mismatch: {predicted.shape} vs {target.shape}")

    n = predicted.size                         # static under jit
    p = predicted.reshape(-1)                  # native dtype; upcast in-kernel
    t = target.reshape(-1)

    lane_rows = n // _LANES
    sub = max(_min_sublanes(predicted.dtype), _min_sublanes(target.dtype))
    tile_rows = min(_MAX_TILE_ROWS, (lane_rows // sub) * sub)

    total = jnp.zeros((), jnp.float32)
    covered = 0

    if tile_rows > 0:
        num_tiles = lane_rows // tile_rows
        num_cores = _NUM_CORES if num_tiles >= _NUM_CORES else 1
        tiles_per_core = num_tiles // num_cores
        covered_rows = num_cores * tiles_per_core * tile_rows
        covered = covered_rows * _LANES

        if n == lane_rows * _LANES:
            # Lane-aligned: reshape is a pure bitcast (no HBM copy); the grid
            # simply never addresses rows >= covered_rows.
            p2 = p.reshape(lane_rows, _LANES)
            t2 = t.reshape(lane_rows, _LANES)
        else:
            # Ragged lane count (rare): slice only the covered prefix.
            p2 = p[:covered].reshape(covered_rows, _LANES)
            t2 = t[:covered].reshape(covered_rows, _LANES)

        row_map = lambda c, i: (c * tiles_per_core + i, 0)
        partials = pl.pallas_call(
            _mse_partial_kernel,
            out_shape=jax.ShapeDtypeStruct((num_cores, 1, _LANES), jnp.float32),
            grid=(num_cores, tiles_per_core),
            in_specs=[pl.BlockSpec((tile_rows, _LANES), row_map),
                      pl.BlockSpec((tile_rows, _LANES), row_map)],
            # One resident (1,128) accumulator block per core.
            out_specs=pl.BlockSpec((None, 1, _LANES), lambda c, i: (c, 0, 0)),
            compiler_params=pltpu.CompilerParams(
                dimension_semantics=("parallel", "arbitrary"),
                vmem_limit_bytes=_VMEM_LIMIT),
        )(p2, t2)
        total = jnp.sum(partials)

    if covered < n:
        # O(tile)-sized tail (ragged rows / odd tile / tiny input): plain jnp.
        tp = p[covered:].astype(jnp.float32)
        tt = t[covered:].astype(jnp.float32)
        total = total + jnp.sum((tp - tt) ** 2)

    # TODO(synk): f32 accumulation; consider a pairwise tree across tiles if
    # element counts reach hundreds of millions.
    return total * jnp.float32(1.0 / n)


class MSELossPallas:
    """Mirrors torch MSELoss module forward: mean reduction, returns .item()."""

    def forward(self, predicted, target, device=None):
        # TODO(synk): the torch `device` argument is a no-op here; JAX arrays
        # are already on the default (TPU) backend.
        mse = jax.block_until_ready(_mse_pallas(predicted, target))
        return float(mse)                      # mirrors .item()

    __call__ = forward


if __name__ == "__main__":
    key = jax.random.PRNGKey(0)
    k1, k2 = jax.random.split(key)
    predicted = jax.random.normal(k1, (2, 4, 16, 16), dtype=jnp.float32)
    target = jax.random.normal(k2, (2, 4, 16, 16), dtype=jnp.float32)

    module = MSELossPallas()
    mse_value = module(predicted, target)

    ref = float(jnp.mean((predicted - target) ** 2))
    assert np.isfinite(mse_value)
    assert abs(mse_value - ref) <= 1e-5 * max(1.0, abs(ref)), (mse_value, ref)
    print("KERNEL_OK")
</pallas_src>

<mosaic_0001>
module attributes {stable_mosaic.version = 11 : i64} {
  func.func @_mse_partial_kernel(%arg0: i32, %arg1: i32, %arg2: memref<16x128xf32, #tpu.memory_space<vmem>>, %arg3: memref<16x128xf32, #tpu.memory_space<vmem>>, %arg4: memref<1x1x128xf32, #tpu.memory_space<vmem>>) attributes {dimension_semantics = [#tpu.dimension_semantics<parallel>, #tpu.dimension_semantics<arbitrary>], iteration_bounds = array<i64: 1, 1>, scalar_prefetch = 0 : i64, scratch_operands = 0 : i64, tpu.core_type = #tpu.core_type<tc>, window_params = [{transform_indices = @transform_0, window_bounds = array<i64: 16, 128>}, {transform_indices = @transform_1, window_bounds = array<i64: 16, 128>}, {transform_indices = @transform_2, window_bounds = array<i64: 1, 1, 128>}]} {
    %c0_i32 = arith.constant 0 : i32
    %0 = arith.cmpi eq, %arg1, %c0_i32 : i32
    %1 = arith.extui %0 : i1 to i32
    %c0_i32_0 = arith.constant 0 : i32
    %2 = arith.cmpi ne, %1, %c0_i32_0 : i32
    scf.if %2 {
      %cst_10 = arith.constant 0.000000e+00 : f32
      %15 = vector.broadcast %cst_10 : f32 to vector<1x128xf32>
      %c0_11 = arith.constant 0 : index
      %c0_12 = arith.constant 0 : index
      %c0_13 = arith.constant 0 : index
      %16 = vector.load %arg4[%c0_11, %c0_12, %c0_13] : memref<1x1x128xf32, #tpu.memory_space<vmem>>, vector<1x1x128xf32>
      %17 = vector.shape_cast %16 : vector<1x1x128xf32> to vector<1x128xf32>
      %18 = vector.shape_cast %15 : vector<1x128xf32> to vector<1x1x128xf32>
      tpu.vector_store %arg4[%c0_11, %c0_12, %c0_13], %18 {strides = array<i32>} : memref<1x1x128xf32, #tpu.memory_space<vmem>>, vector<1x1x128xf32>,
    } else {
    }
    %c0 = arith.constant 0 : index
    %c0_1 = arith.constant 0 : index
    %3 = vector.load %arg2[%c0, %c0_1] : memref<16x128xf32, #tpu.memory_space<vmem>>, vector<16x128xf32>
    %c0_2 = arith.constant 0 : index
    %c0_3 = arith.constant 0 : index
    %4 = vector.load %arg3[%c0_2, %c0_3] : memref<16x128xf32, #tpu.memory_space<vmem>>, vector<16x128xf32>
    %5 = arith.subf %3, %4 : vector<16x128xf32>
    %c0_4 = arith.constant 0 : index
    %c0_5 = arith.constant 0 : index
    %c0_6 = arith.constant 0 : index
    %6 = vector.load %arg4[%c0_4, %c0_5, %c0_6] : memref<1x1x128xf32, #tpu.memory_space<vmem>>, vector<1x1x128xf32>
    %7 = vector.shape_cast %6 : vector<1x1x128xf32> to vector<1x128xf32>
    %8 = arith.mulf %5, %5 : vector<16x128xf32>
    %cst = arith.constant dense<0.000000e+00> : vector<128xf32>
    %9 = vector.multi_reduction <add>, %8, %cst [0] : vector<16x128xf32> to vector<128xf32>
    %10 = vector.shape_cast %9 : vector<128xf32> to vector<1x128xf32>
    %11 = arith.addf %7, %10 : vector<1x128xf32>
    %c0_7 = arith.constant 0 : index
    %c0_8 = arith.constant 0 : index
    %c0_9 = arith.constant 0 : index
    %12 = vector.load %arg4[%c0_7, %c0_8, %c0_9] : memref<1x1x128xf32, #tpu.memory_space<vmem>>, vector<1x1x128xf32>
    %13 = vector.shape_cast %12 : vector<1x1x128xf32> to vector<1x128xf32>
    %14 = vector.shape_cast %11 : vector<1x128xf32> to vector<1x1x128xf32>
    tpu.vector_store %arg4[%c0_7, %c0_8, %c0_9], %14 {strides = array<i32>} : memref<1x1x128xf32, #tpu.memory_space<vmem>>, vector<1x1x128xf32>,
    return
  }
  func.func @transform_0(%arg0: i32, %arg1: i32) -> (i32, i32) {
    %c1_i32 = arith.constant 1 : i32
    %0 = arith.muli %arg0, %c1_i32 : i32
    %1 = arith.addi %0, %arg1 : i32
    %c0_i32 = arith.constant 0 : i32
    %c0_i32_0 = arith.constant 0 : i32
    return %1, %c0_i32 : i32, i32
  }
  func.func @transform_1(%arg0: i32, %arg1: i32) -> (i32, i32) {
    %c1_i32 = arith.constant 1 : i32
    %0 = arith.muli %arg0, %c1_i32 : i32
    %1 = arith.addi %0, %arg1 : i32
    %c0_i32 = arith.constant 0 : i32
    %c0_i32_0 = arith.constant 0 : i32
    return %1, %c0_i32 : i32, i32
  }
  func.func @transform_2(%arg0: i32, %arg1: i32) -> (i32, i32, i32) {
    %c0_i32 = arith.constant 0 : i32
    %c0_i32_0 = arith.constant 0 : i32
    %c0_i32_1 = arith.constant 0 : i32
    return %arg0, %c0_i32, %c0_i32_0 : i32, i32, i32
  }
}

</mosaic_0001>

<bundles_post_ra>
// kernel: _mse_pallas.1
= control target key start
LH: loop header
LB: loop body
LE: loop exit
PB: predicated region body
PF: predicated region fallthrough
CT: control target
= control target key end

     0   :  { %v95_v0 = vmov 0.0   ;;  %s132_s2 = inlined_call_operand.vmem [shape: f32[1,1,128], index: 2, kind: output, shape index: {}]   ;;  %s133_s0 = inlined_call_operand.vmem [shape: f32[16,128], index: 0, kind: input, shape index: {}]   ;;  %s134_s1 = inlined_call_operand.vmem [shape: f32[16,128], index: 1, kind: input, shape index: {}]  }
   0x1   :  { %59 = vst [vmem:[%s132_s2] sm:$0x1] %v95_v0  ;;  %v60_v1 = vld [vmem:[%s133_s0] sm:$0xff]  ;;  %v61_v2 = vld [vmem:[%s133_s0 + $0x8] sm:$0xff] }
   0x2   :  { %v62_v3 = vld [vmem:[%s134_s1] sm:$0xff]  ;;  %v63_v4 = vld [vmem:[%s134_s1 + $0x8] sm:$0xff] }
   0x3   :  { %v64_v5 = vsub.f32 %v60_v1, %v62_v3  ;;  %v65_v6 = vsub.f32 %v61_v2, %v63_v4 }
   0x5   :  { %v67_v7 = vmul.f32 %v64_v5, %v64_v5  ;;  %v68_v8 = vmul.f32 %v65_v6, %v65_v6 }
   0x7   :  { %v69_v9 = vadd.f32 %v68_v8, %v67_v7 }
   0x8   :  { %v66_v15 = vld [vmem:[%s132_s2] sm:$0x1] }
   0x9   :  { %v70_v10 = vrot.slane %v69_v9, 4 }
   0xb   :  { %v71_v11 = vadd.f32 %v70_v10, %v69_v9 }
   0xd   :  { %v72_v12 = vrot.slane %v71_v11, 2 }
   0xf   :  { %v73_v13 = vadd.f32 %v72_v12, %v71_v11 }
  0x11   :  { %v74_v14 = vrot.slane %v73_v13, 1 }
  0x13   :  { %v75_v16 = vadd.f32 %v74_v14, %v73_v13 }
  0x15   :  { %v76_v17 = vadd.f32 %v75_v16, %v66_v15 }
  0x17   :  { %77 = vst [vmem:[%s132_s2] sm:$0x1] %v76_v17 }

</bundles_post_ra>
